<compile_context>
chip_gen: v7x
topology: tpu7x:2x2x1
jax: 0.10.0
libtpu: 0.0.40
codegen_flags: <defaults>
</compile_context>

<pallas_src>
import jax
import jax.numpy as jnp
import numpy as np
from jax.experimental import pallas as pl
from jax.experimental.pallas import tpu as pltpu

_LANE = 128  # lane-dense (zero-padded) class dimension


def _nli_head_kernel(p_ref, h_ref, wp_ref, wh_ref, wx_ref, b_ref, out_ref):
    pv = p_ref[...]                                                    # (TB, E)
    hv = h_ref[...]                                                    # (TB, E)
    # Elementwise product in f32 (VPU), then cast to the MXU operand dtype.
    prod = (pv.astype(jnp.float32) * hv.astype(jnp.float32)).astype(wx_ref.dtype)
    acc = jnp.dot(pv, wp_ref[...], preferred_element_type=jnp.float32)
    acc = acc + jnp.dot(hv, wh_ref[...], preferred_element_type=jnp.float32)
    acc = acc + jnp.dot(prod, wx_ref[...], preferred_element_type=jnp.float32)
    out_ref[...] = (acc + b_ref[...]).astype(out_ref.dtype)            # (TB, 128)


def _round_up(x, m):
    return (x + m - 1) // m * m


def _vmem_capacity_bytes():
    """Per-core VMEM capacity; conservative fallback = v7x (64 MiB)."""
    try:
        return int(pltpu.get_tpu_info().vmem_capacity_bytes)
    except Exception:
        return 64 << 20


def bert_based_nli_head(p_vectors, h_vectors, w1, b1, w2, b2, *,
                        tile_b=None, compute_dtype=jnp.bfloat16, out_dtype=None):
    """logits = Linear(H,C)(Linear(3E,H)(cat[p, h, p*h])).

    Args:
      p_vectors, h_vectors: (B, E) precomputed sentence embeddings.
      w1, b1: nli_hidden_layer params, torch layout (H, 3E), (H,).
      w2, b2: nli_classifier params, torch layout (C, H), (C,).
      tile_b: batch tile (multiple of 8 for f32, 16 for bf16). Auto if None.
      compute_dtype: MXU operand dtype (bfloat16 default); accumulation is f32.
      out_dtype: logits dtype (defaults to compute_dtype to halve writeback).
    Returns:
      (B, C) logits in out_dtype.
    """
    B, E = p_vectors.shape
    H, threeE = w1.shape
    assert threeE == 3 * E
    C = w2.shape[0]
    assert w2.shape == (C, H) and b1.shape == (H,) and b2.shape == (C,)
    assert C <= _LANE

    compute_dtype = jnp.dtype(compute_dtype)
    out_dtype = compute_dtype if out_dtype is None else jnp.dtype(out_dtype)
    act_bytes = compute_dtype.itemsize
    out_bytes = out_dtype.itemsize

    # ---- host-side layer fusion (no activation between the two Linears) ----
    w1 = jnp.asarray(w1, jnp.float32)
    w2 = jnp.asarray(w2, jnp.float32)
    b1 = jnp.asarray(b1, jnp.float32)
    b2 = jnp.asarray(b2, jnp.float32)
    w_fused = w1.T @ w2.T                                    # (3E, C)
    b_fused = b1 @ w2.T + b2                                 # (C,)

    # ---- lane-dense zero padding of the class dimension ----
    wf = jnp.zeros((3 * E, _LANE), jnp.float32).at[:, :C].set(w_fused)
    bf = jnp.zeros((1, _LANE), jnp.float32).at[0, :C].set(b_fused)
    wp = wf[0 * E:1 * E].astype(compute_dtype)               # (E, 128) p-part
    wh = wf[1 * E:2 * E].astype(compute_dtype)               # (E, 128) h-part
    wx = wf[2 * E:3 * E].astype(compute_dtype)               # (E, 128) prod-part

    p_vectors = p_vectors.astype(compute_dtype)
    h_vectors = h_vectors.astype(compute_dtype)

    # ---- generation-aware batch tiling ----
    sub = 16 if act_bytes == 2 else 8          # sublane packing of compute dtype
    cap = 2048 if act_bytes == 2 else 1024     # f32 cap keeps v5e (16 MiB scoped) safe
    capacity = _vmem_capacity_bytes()
    budget = (capacity * 5) // 8               # leave compiler/internal headroom

    # Complete per-row / constant VMEM accounting (double-buffered activations
    # and output, resident double-buffered fused weights + bias, in-kernel f32
    # product & upcast temps, f32 accumulator temps).
    per_row = (2 * 2 * E * act_bytes           # p, h tiles (x2 buffers)
               + 2 * _LANE * out_bytes         # output tile (x2 buffers)
               + 3 * E * 4                     # f32 product + pv/hv upcast temps
               + 4 * _LANE * 4)                # f32 accumulator temps
    const = 3 * 2 * E * _LANE * act_bytes + 2 * 2 * _LANE * 4

    if tile_b is None:
        tile_from_vmem = max(sub, ((budget - const) // per_row) // sub * sub)
        tile_b = min(cap, tile_from_vmem, _round_up(B, sub))
        if B > sub:
            # >= 2 grid steps so v7x's second TensorCore gets work
            # (no effect on single-TC v5e/v6e).
            tile_b = min(tile_b, _round_up(B, 2 * sub) // 2)
        tile_b = max(sub, (tile_b // sub) * sub)
    assert tile_b % sub == 0, f"tile_b must be a multiple of {sub} for {compute_dtype}"

    B_pad = _round_up(B, tile_b)
    if B_pad != B:
        pad = B_pad - B
        p_vectors = jnp.pad(p_vectors, ((0, pad), (0, 0)))
        h_vectors = jnp.pad(h_vectors, ((0, pad), (0, 0)))
    grid = (B_pad // tile_b,)

    vmem_needed = per_row * tile_b + const
    vmem_limit = int(min(capacity - (1 << 20),
                         max(vmem_needed + (16 << 20), 32 << 20)))

    cost = pl.CostEstimate(
        flops=int(6 * B_pad * E * _LANE + 3 * B_pad * E),
        transcendentals=0,
        bytes_accessed=int(2 * B_pad * E * act_bytes        # p, h reads
                           + B_pad * _LANE * out_bytes      # logits write
                           + 3 * E * _LANE * act_bytes      # fused weights
                           + _LANE * 4),                    # fused bias
    )

    out_padded = pl.pallas_call(
        _nli_head_kernel,
        out_shape=jax.ShapeDtypeStruct((B_pad, _LANE), out_dtype),
        grid_spec=pl.GridSpec(
            grid=grid,
            in_specs=[
                pl.BlockSpec((tile_b, E), lambda i: (i, 0)),     # p tile
                pl.BlockSpec((tile_b, E), lambda i: (i, 0)),     # h tile
                pl.BlockSpec((E, _LANE), lambda i: (0, 0)),      # Wf_p    (resident)
                pl.BlockSpec((E, _LANE), lambda i: (0, 0)),      # Wf_h    (resident)
                pl.BlockSpec((E, _LANE), lambda i: (0, 0)),      # Wf_prod (resident)
                pl.BlockSpec((1, _LANE), lambda i: (0, 0)),      # fused bias
            ],
            out_specs=pl.BlockSpec((tile_b, _LANE), lambda i: (i, 0)),
        ),
        compiler_params=pltpu.CompilerParams(
            dimension_semantics=("parallel",),
            vmem_limit_bytes=vmem_limit,
        ),
        cost_estimate=cost,
    )(p_vectors, h_vectors, wp, wh, wx, bf)

    # TODO(synk): ideally the [:B, :C] slice is folded into the consumer; kept
    # here so the wrapper returns exactly the module's (B, C) logits.
    return out_padded[:B, :C]


def _torch_linear_init(key, out_features, in_features):
    """Deterministic init mirroring nn.Linear default (uniform +/- 1/sqrt(in))."""
    k_w, k_b = jax.random.split(key)
    bound = 1.0 / np.sqrt(in_features)
    w = jax.random.uniform(k_w, (out_features, in_features), jnp.float32,
                           minval=-bound, maxval=bound)
    b = jax.random.uniform(k_b, (out_features,), jnp.float32,
                           minval=-bound, maxval=bound)
    return w, b


if __name__ == "__main__":
    # Small synthetic config consistent with the module (merged_input=False):
    B = 32           # batch
    E = 32           # self.embedding_size (BERT sentence-embedding width)
    H = 64           # hidden_size
    C = 3            # NLI classes

    key = jax.random.PRNGKey(0)
    k_p, k_h, k_l1, k_l2 = jax.random.split(key, 4)

    # Precomputed sentence embeddings (stand-ins for BERT pooler outputs).
    p_vectors = jax.random.normal(k_p, (B, E), jnp.float32)
    h_vectors = jax.random.normal(k_h, (B, E), jnp.float32)

    # nli_hidden_layer = nn.Linear(3*E, H); nli_classifier = nn.Linear(H, 3)
    w1, b1 = _torch_linear_init(k_l1, H, 3 * E)   # (H, 3E), (H,)
    w2, b2 = _torch_linear_init(k_l2, C, H)       # (C, H),  (C,)

    # Plain-JAX reference == PyTorch forward_with_precomputed_embeddings.
    concat = jnp.concatenate([p_vectors, h_vectors, p_vectors * h_vectors], axis=-1)
    ref = (concat @ w1.T + b1) @ w2.T + b2

    # f32 path (strict accuracy check); auto-tiled -> 2 grid steps at B=32.
    logits_f32 = jax.block_until_ready(
        bert_based_nli_head(p_vectors, h_vectors, w1, b1, w2, b2,
                            compute_dtype=jnp.float32, out_dtype=jnp.float32))
    assert logits_f32.shape == (B, C)
    np.testing.assert_allclose(np.asarray(logits_f32), np.asarray(ref),
                               rtol=1e-4, atol=1e-4)

    # Default path: bf16 operands + bf16 logits, f32 MXU accumulation,
    # f32 elementwise product (v6e/v7x-friendly, halves HBM traffic).
    logits_bf16 = jax.block_until_ready(
        bert_based_nli_head(p_vectors, h_vectors, w1, b1, w2, b2))
    assert logits_bf16.shape == (B, C)
    np.testing.assert_allclose(np.asarray(logits_bf16, dtype=np.float32),
                               np.asarray(ref), rtol=5e-2, atol=1e-1)

    print("KERNEL_OK")
</pallas_src>

<mosaic_0001>
module attributes {stable_mosaic.version = 11 : i64} {
  func.func @_nli_head_kernel(%arg0: i32, %arg1: memref<16x32xf32, #tpu.memory_space<vmem>>, %arg2: memref<16x32xf32, #tpu.memory_space<vmem>>, %arg3: memref<32x128xf32, #tpu.memory_space<vmem>>, %arg4: memref<32x128xf32, #tpu.memory_space<vmem>>, %arg5: memref<32x128xf32, #tpu.memory_space<vmem>>, %arg6: memref<1x128xf32, #tpu.memory_space<vmem>>, %arg7: memref<16x128xf32, #tpu.memory_space<vmem>>) attributes {dimension_semantics = [#tpu.dimension_semantics<parallel>], iteration_bounds = array<i64: 2>, scalar_prefetch = 0 : i64, scratch_operands = 0 : i64, tpu.core_type = #tpu.core_type<tc>, window_params = [{transform_indices = @transform_0, window_bounds = array<i64: 16, 32>}, {transform_indices = @transform_1, window_bounds = array<i64: 16, 32>}, {pipeline_mode = #tpu.pipeline_mode<synchronous>, transform_indices = @transform_2, window_bounds = array<i64: 32, 128>}, {pipeline_mode = #tpu.pipeline_mode<synchronous>, transform_indices = @transform_3, window_bounds = array<i64: 32, 128>}, {pipeline_mode = #tpu.pipeline_mode<synchronous>, transform_indices = @transform_4, window_bounds = array<i64: 32, 128>}, {pipeline_mode = #tpu.pipeline_mode<synchronous>, transform_indices = @transform_5, window_bounds = array<i64: 1, 128>}, {transform_indices = @transform_6, window_bounds = array<i64: 16, 128>}]} {
    %c0 = arith.constant 0 : index
    %c0_0 = arith.constant 0 : index
    %0 = vector.load %arg1[%c0, %c0_0] : memref<16x32xf32, #tpu.memory_space<vmem>>, vector<16x32xf32>
    %c0_1 = arith.constant 0 : index
    %c0_2 = arith.constant 0 : index
    %1 = vector.load %arg2[%c0_1, %c0_2] : memref<16x32xf32, #tpu.memory_space<vmem>>, vector<16x32xf32>
    %2 = arith.mulf %0, %1 : vector<16x32xf32>
    %c0_3 = arith.constant 0 : index
    %c0_4 = arith.constant 0 : index
    %3 = vector.load %arg3[%c0_3, %c0_4] : memref<32x128xf32, #tpu.memory_space<vmem>>, vector<32x128xf32>
    %cst = arith.constant dense<0.000000e+00> : vector<16x128xf32>
    %4 = tpu.matmul %0, %3, %cst {dimension_numbers = #tpu.dot_dimension_numbers<[1], [0], [0], [1], [0, 0, 1, 1], [], []>} : vector<16x32xf32>, vector<32x128xf32>, vector<16x128xf32> -> vector<16x128xf32>
    %c0_5 = arith.constant 0 : index
    %c0_6 = arith.constant 0 : index
    %5 = vector.load %arg4[%c0_5, %c0_6] : memref<32x128xf32, #tpu.memory_space<vmem>>, vector<32x128xf32>
    %cst_7 = arith.constant dense<0.000000e+00> : vector<16x128xf32>
    %6 = tpu.matmul %1, %5, %cst_7 {dimension_numbers = #tpu.dot_dimension_numbers<[1], [0], [0], [1], [0, 0, 1, 1], [], []>} : vector<16x32xf32>, vector<32x128xf32>, vector<16x128xf32> -> vector<16x128xf32>
    %7 = arith.addf %4, %6 : vector<16x128xf32>
    %c0_8 = arith.constant 0 : index
    %c0_9 = arith.constant 0 : index
    %8 = vector.load %arg5[%c0_8, %c0_9] : memref<32x128xf32, #tpu.memory_space<vmem>>, vector<32x128xf32>
    %cst_10 = arith.constant dense<0.000000e+00> : vector<16x128xf32>
    %9 = tpu.matmul %2, %8, %cst_10 {dimension_numbers = #tpu.dot_dimension_numbers<[1], [0], [0], [1], [0, 0, 1, 1], [], []>} : vector<16x32xf32>, vector<32x128xf32>, vector<16x128xf32> -> vector<16x128xf32>
    %10 = arith.addf %7, %9 : vector<16x128xf32>
    %c0_11 = arith.constant 0 : index
    %c0_12 = arith.constant 0 : index
    %11 = vector.load %arg6[%c0_11, %c0_12] : memref<1x128xf32, #tpu.memory_space<vmem>>, vector<1x128xf32>
    %12 = vector.broadcast %11 : vector<1x128xf32> to vector<16x128xf32>
    %13 = arith.addf %10, %12 : vector<16x128xf32>
    %c0_13 = arith.constant 0 : index
    %c0_14 = arith.constant 0 : index
    %14 = vector.load %arg7[%c0_13, %c0_14] : memref<16x128xf32, #tpu.memory_space<vmem>>, vector<16x128xf32>
    tpu.vector_store %arg7[%c0_13, %c0_14], %13 {strides = array<i32>} : memref<16x128xf32, #tpu.memory_space<vmem>>, vector<16x128xf32>,
    return
  }
  func.func @transform_0(%arg0: i32) -> (i32, i32) {
    %c0_i32 = arith.constant 0 : i32
    %c0_i32_0 = arith.constant 0 : i32
    return %arg0, %c0_i32 : i32, i32
  }
  func.func @transform_1(%arg0: i32) -> (i32, i32) {
    %c0_i32 = arith.constant 0 : i32
    %c0_i32_0 = arith.constant 0 : i32
    return %arg0, %c0_i32 : i32, i32
  }
  func.func @transform_2(%arg0: i32) -> (i32, i32) {
    %c0_i32 = arith.constant 0 : i32
    %c0_i32_0 = arith.constant 0 : i32
    %c0_i32_1 = arith.constant 0 : i32
    return %c0_i32, %c0_i32_0 : i32, i32
  }
  func.func @transform_3(%arg0: i32) -> (i32, i32) {
    %c0_i32 = arith.constant 0 : i32
    %c0_i32_0 = arith.constant 0 : i32
    %c0_i32_1 = arith.constant 0 : i32
    return %c0_i32, %c0_i32_0 : i32, i32
  }
  func.func @transform_4(%arg0: i32) -> (i32, i32) {
    %c0_i32 = arith.constant 0 : i32
    %c0_i32_0 = arith.constant 0 : i32
    %c0_i32_1 = arith.constant 0 : i32
    return %c0_i32, %c0_i32_0 : i32, i32
  }
  func.func @transform_5(%arg0: i32) -> (i32, i32) {
    %c0_i32 = arith.constant 0 : i32
    %c0_i32_0 = arith.constant 0 : i32
    %c0_i32_1 = arith.constant 0 : i32
    return %c0_i32, %c0_i32_0 : i32, i32
  }
  func.func @transform_6(%arg0: i32) -> (i32, i32) {
    %c0_i32 = arith.constant 0 : i32
    %c0_i32_0 = arith.constant 0 : i32
    return %arg0, %c0_i32 : i32, i32
  }
}

</mosaic_0001>

<bundles_post_ra>
// kernel: tpu_custom_call.1
= control target key start
LH: loop header
LB: loop body
LE: loop exit
PB: predicated region body
PF: predicated region fallthrough
CT: control target
= control target key end

     0   :  { %s1576_s0 = inlined_call_operand.hbm [shape: f32[32,32], index: 0, kind: input, shape index: {}]   ;;  %s1577_s1 = inlined_call_operand.hbm [shape: f32[32,32], index: 1, kind: input, shape index: {}]   ;;  %s1578_s2 = inlined_call_operand.hbm [shape: f32[32,128], index: 2, kind: input, shape index: {}]   ;;  %s1579_s3 = inlined_call_operand.hbm [shape: f32[32,128], index: 3, kind: input, shape index: {}]   ;;  %s1580_s4 = inlined_call_operand.hbm [shape: f32[32,128], index: 4, kind: input, shape index: {}]   ;;  %s1581_s5 = inlined_call_operand.vmem [shape: f32[1,128], index: 5, kind: input, shape index: {}]   ;;  %s1582_s6 = inlined_call_operand.hbm [shape: f32[32,128], index: 6, kind: output, shape index: {}]  }
   0x1   :  { %1590 = sst [smem:[#allocation18_spill]] %s1576_s0 }
   0x2   :  { %1591 = sst [smem:[#allocation19_spill]] %s1578_s2 }
   0x3   :  { %1592 = sst [smem:[#allocation20_spill]] %s1579_s3 }
   0x4   :  { %1593 = sst [smem:[#allocation21_spill]] %s1580_s4 }
   0x5   :  { %11 = vsyncpa [#allocation3], 0 }
   0x6   :  { %13 = vsyncpa [#allocation3 + $0x1], 0 }
   0x7   :  { %14 = vsyncpa [#allocation6], 0 }
   0x8   :  { %16 = vsyncpa [#allocation6 + $0x1], 0 }
   0x9   :  { %17 = vsyncpa [#allocation9], 0 }
   0xa   :  { %18 = vsyncpa [#allocation4], 0 }
   0xb   :  { %20 = vsyncpa [#allocation4 + $0x1], 0  ;;  %s1237_s21 = smov 0   ;;  %s1239_s22 = smov 0  }
   0xc   :  { %s1241_s23 = smov 0   ;;  %s1243_s24 = smov 0  }
   0xd LB: > { %s1258_s25 = sadd.s32 4294967295, %s1190_s24   ;;  %s769_s26 = sadd.s32 4294967294, %s1190_s24   ;;  %s1190_s24 = sphi %s1243_s24, %s1621_s24   ;;  %s1186_s23 = sphi %s1241_s23, %s1620_s23   ;;  %s1182_s22 = sphi %s1239_s22, %s1619_s22   ;;  %s1178_s21 = sphi %s1237_s21, %s1618_s21  }
   0xe   : > { %p46_p0 = scmp.ne.s32.totalorder %s1182_s22, %s1178_s21  ;;  %p1583_p1 = scmp.eq.s32.totalorder %s1258_s25, 0 }
   0xf   : > { %p186_p3 = scmp.eq.s32.totalorder %s769_s26, 1  ;;  %p770_p5 = scmp.ge.s32.totalorder %s1190_s24, 1 }
  0x10   : > { %p1267_p4 = por %p1583_p1, %p46_p0  ;;  %p193_p7 = scmp.lt.s32.totalorder %s1190_s24, 3 }
  0x11   : > { %p1272_p6 = por %p186_p3, %p46_p0  ;;  %s1192_s30 = smov [#allocation7]  }
  0x12   : > { %s1594_s27 = scalar_select %p1267_p4, 1, 0 }
  0x13   : > { %s1595_s28 = scalar_select %p1272_p6, 1, 0 }
  0x14   : > { %p1277_p8 = pnand %p770_p5, %p193_p7  ;;  %s205_s7 = sshll.u32 %s1192_s30, 4  ;;  %s1281_s7 = int_to_ptr.vmem [resolvable:$true] %s205_s7 }
  0x15   : > { %s1193_s9 = smov [#allocation8]   ;;  %s1194_s11 = smov [#allocation10]  }
  0x16   : > { %s1596_s29 = scalar_select %p1277_p8, 1, 0 }
  0x17   : > { %p900_p9 = pneg %p1277_p8  ;;  %s218_s10 = sshll.u32 %s1193_s9, 4  ;;  %s1292_s10 = int_to_ptr.vmem [resolvable:$true] %s218_s10 }
  0x18   : > { %s1294_s12 = sshll.u32 %s1194_s11, 4  ;;  %s1598_s2 = sld [smem:[#allocation19_spill]]  ;;  %s232_s12 = int_to_ptr.vmem [resolvable:$true] %s1294_s12 }
  0x19   : > { %p1288_p11 = pnand %p900_p9, %p1583_p1 }
  0x1b   : > { %p1304_p13 = pneg %p1288_p11 }
  0x1e   : > { %s968_s15 = scalar_lea.hbm %s1598_s2, 512 }
  0x1f   : > { %p969_p12 = scmp.ne.s32.totalorder %s1598_s2, %s968_s15  ;;  %p975_p5 = scmp.lt.u32.totalorder %s968_s15, %s1598_s2 }
  0x21   : > { %p971_p0 = pnand %p1304_p13, %p969_p12 }
  0x23   : > { %p972_p3 = pneg %p971_p0 }
  0x25   : > { %p977_p7 = pnand %p975_p5, %p972_p3 }
  0x27   : > { %980 = shalt.err (!%p977_p7)
}
  0x28   : > { %s981_s26 = scalar_lea.vmem %s1281_s7, 512  ;;  %p989_p2 = scmp.lt.s32.totalorder %s1281_s7, %s1281_s7 }
  0x29   : > { %p982_p9 = scmp.ne.s32.totalorder %s1281_s7, %s981_s26  ;;  %p990_p6 = scmp.lt.s32.totalorder %s981_s26, %s981_s26 }
  0x2b   : > { %p984_p10 = pnand %p982_p9, %p1304_p13  ;;  %p991_p12 = por %p990_p6, %p989_p2 }
  0x2d   : > { %p985_p1 = pneg %p984_p10 }
  0x2f   : > { %p992_p0 = pnand %p991_p12, %p985_p1 }
  0x31   : > { %995 = shalt.err (!%p992_p0)
}
  0x32   : > { %s1586_s30 = smov 128   ;;  %s1588_s9 = smov 8  }
  0x33   : > { %903 = dma.hbm_to_vmem [thread:$0]  (!%p1288_p11), %s1598_s2, 512, %s1281_s7, [#allocation6], %s1586_s30, %s1586_s30, %s1588_s9  }
  0x34   : > { %s1600_s3 = sld [smem:[#allocation20_spill]] }
  0x3a   : > { %s996_s16 = scalar_lea.hbm %s1600_s3, 512 }
  0x3b   : > { %p997_p1 = scmp.ne.s32.totalorder %s1600_s3, %s996_s16  ;;  %p1003_p10 = scmp.lt.u32.totalorder %s996_s16, %s1600_s3 }
  0x3d   : > { %p999_p2 = pnand %p997_p1, %p1304_p13 }
  0x3f   : > { %p1000_p6 = pneg %p999_p2 }
  0x41   : > { %p1005_p3 = pnand %p1003_p10, %p1000_p6 }
  0x43   : > { %1008 = shalt.err (!%p1005_p3)
}
  0x44   : > { %s1009_s7 = scalar_lea.vmem %s1292_s10, 512  ;;  %p1017_p12 = scmp.lt.s32.totalorder %s1292_s10, %s1292_s10 }
  0x45   : > { %p1010_p5 = scmp.ne.s32.totalorder %s1292_s10, %s1009_s7  ;;  %p1018_p0 = scmp.lt.s32.totalorder %s1009_s7, %s1009_s7 }
  0x47   : > { %p1012_p7 = pnand %p1010_p5, %p1304_p13  ;;  %p1019_p1 = por %p1018_p0, %p1017_p12 }
  0x49   : > { %p1013_p9 = pneg %p1012_p7 }
  0x4b   : > { %p1020_p2 = pnand %p1019_p1, %p1013_p9 }
  0x4d   : > { %1023 = shalt.err (!%p1020_p2)
}
  0x4e   : > { %906 = dma.hbm_to_vmem [thread:$0]  (!%p1288_p11), %s1600_s3, 512, %s1292_s10, [#allocation9], %s1586_s30, %s1586_s30, %s1588_s9  }
  0x4f   : > { %s1601_s4 = sld [smem:[#allocation21_spill]] }
  0x55   : > { %s1024_s16 = scalar_lea.hbm %s1601_s4, 512 }
  0x56   : > { %p1025_p6 = scmp.ne.s32.totalorder %s1601_s4, %s1024_s16  ;;  %p1031_p5 = scmp.lt.u32.totalorder %s1024_s16, %s1601_s4 }
  0x58   : > { %p1027_p10 = pnand %p1025_p6, %p1304_p13 }
  0x5a   : > { %p1028_p3 = pneg %p1027_p10 }
  0x5c   : > { %p1033_p7 = pnand %p1031_p5, %p1028_p3 }
  0x5e   : > { %1036 = shalt.err (!%p1033_p7)
}
  0x5f   : > { %s1037_s7 = scalar_lea.vmem %s232_s12, 512  ;;  %p1045_p1 = scmp.lt.s32.totalorder %s232_s12, %s232_s12 }
  0x60   : > { %p1038_p9 = scmp.ne.s32.totalorder %s232_s12, %s1037_s7  ;;  %p1046_p2 = scmp.lt.s32.totalorder %s1037_s7, %s1037_s7 }
  0x62   : > { %p1040_p12 = pnand %p1038_p9, %p1304_p13  ;;  %p1047_p4 = por %p1046_p2, %p1045_p1 }
  0x64   : > { %p1041_p0 = pneg %p1040_p12 }
  0x66   : > { %p1048_p8 = pnand %p1047_p4, %p1041_p0 }
  0x68   : > { %1051 = shalt.err (!%p1048_p8)
}
  0x69   : > { %909 = dma.hbm_to_vmem [thread:$0]  (!%p1288_p11), %s1601_s4, 512, %s232_s12, [#allocation9], %s1586_s30, %s1586_s30, %s1588_s9  }
  0x6a   : > { %s1377_s18 = sadd.s32 1, %s1190_s24   ;;  %s33_s13 = sadd.s32 1, %s1186_s23 }
  0x6b   : > { %s30_s8 = ssub.s32 %s1190_s24, %s1377_s18  ;;  %p40_p8 = scmp.ne.s32.totalorder %s1186_s23, %s1182_s22 }
  0x6c   : > { %p31_p4 = scmp.eq.s32.totalorder %s30_s8, 0  ;;  %p41_p13 = scmp.eq.s32.totalorder %s1190_s24, 0 }
  0x6d   : > { %p924_p6 = scmp.lt.s32.totalorder %s1190_s24, 2  ;;  %p1603_p3 = scmp.eq.s32.totalorder %s1258_s25, 1 }
  0x6e   : > { %s1387_s14 = scalar_select %p31_p4, %s1186_s23, %s33_s13  }
  0x6f   : > { %p42_p10 = por %p41_p13, %p40_p8  ;;  %p1391_p5 = por %p1603_p3, %p40_p8 }
  0x70   : > { %1602 = sst [smem:[#allocation17_spill]] %s1387_s14  ;;  %s248_s16 = sand.u32 1, %s1186_s23  }
  0x71   : > { %s800_s17 = sshll.u32 %s1190_s24, 8  ;;  %s1397_s12 = sshll.u32 %s248_s16, 4 }
  0x72   : > { %s1605_s0 = sld [smem:[#allocation18_spill]]  ;;  %s252_s7 = scalar_lea.vmem [#allocation2], %s1397_s12 }
  0x73   : > { %s259_s10 = sshll.u32 %s252_s7, 4  ;;  %p1405_p11 = pnand %p924_p6, %p42_p10  ;;  %s1409_s10 = int_to_ptr.vmem [resolvable:$true] %s259_s10 }
  0x74   : > { %s1414_s19 = scalar_lea.hbm %s1577_s1, %s800_s17  ;;  %s1416_s20 = scalar_lea.sflag [#allocation3], %s248_s16 }
  0x75   : > { %p1054_p9 = pneg %p1405_p11 }
  0x78   : > { %s1402_s26 = scalar_lea.hbm %s1605_s0, %s800_s17  ;;  %s1057_s2 = scalar_lea.hbm %s1605_s0, 512 }
  0x79   : > { %s1052_s30 = scalar_lea.hbm %s1402_s26, 256  ;;  %p1058_p1 = scmp.lt.u32.totalorder %s1402_s26, %s1605_s0 }
  0x7a   : > { %p1053_p7 = scmp.ne.s32.totalorder %s1402_s26, %s1052_s30  ;;  %p1059_p2 = scmp.lt.u32.totalorder %s1057_s2, %s1052_s30 }
  0x7b   : > { %p1061_p8 = scmp.lt.u32.totalorder %s1052_s30, %s1402_s26 }
  0x7c   : > { %p1055_p12 = pnand %p1054_p9, %p1053_p7  ;;  %p1060_p4 = por %p1059_p2, %p1058_p1 }
  0x7e   : > { %p1056_p0 = pneg %p1055_p12  ;;  %p1062_p13 = por %p1061_p8, %p1060_p4 }
  0x80   : > { %p1063_p6 = pnand %p1062_p13, %p1056_p0 }
  0x82   : > { %1066 = shalt.err (!%p1063_p6)
}
  0x83   : > { %s1067_s16 = scalar_lea.vmem %s1409_s10, 256  ;;  %s1197_s9 = smov [#allocation2]  }
  0x84   : > { %p1068_p10 = scmp.ne.s32.totalorder %s1409_s10, %s1067_s16  ;;  %s1072_s17 = sshll.u32 %s1197_s9, 4  ;;  %s1073_s17 = int_to_ptr.vmem [resolvable:$false] %s1072_s17 }
  0x85   : > { %s1074_s3 = scalar_lea.vmem %s1073_s17, 512  ;;  %p1075_p12 = scmp.lt.s32.totalorder %s1409_s10, %s1073_s17 }
  0x86   : > { %p1070_p3 = pnand %p1068_p10, %p1054_p9  ;;  %p1076_p1 = scmp.lt.s32.totalorder %s1074_s3, %s1067_s16 }
  0x88   : > { %p1071_p7 = pneg %p1070_p3  ;;  %p1077_p2 = por %p1076_p1, %p1075_p12 }
  0x8a   : > { %p1078_p4 = pnand %p1077_p2, %p1071_p7 }
  0x8c   : > { %1081 = shalt.err (!%p1078_p4)
}
  0x8d   : > { %s1607_s2 = smov 8   ;;  %s1608_s4 = smov 128  }
  0x8e   : > { %913 = dma.hbm_to_vmem [thread:$0]  (!%p1405_p11), %s1402_s26, 256, %s1409_s10, %s1416_s20, %s1608_s4, %s1608_s4, %s1607_s2  }
  0x8f   : > { %s273_s30 = scalar_lea.vmem [#allocation5], %s1397_s12  ;;  %s269_s13 = sand.u32 1, %s1190_s24  }
  0x90   : > { %s280_s8 = sshll.u32 %s273_s30, 4  ;;  %s1451_s7 = scalar_lea.sflag [#allocation6], %s269_s13  ;;  %s1449_s8 = int_to_ptr.vmem [resolvable:$true] %s280_s8 }
  0x91   : > { %s1082_s16 = scalar_lea.hbm %s1414_s19, 256  ;;  %s1087_s3 = scalar_lea.hbm %s1577_s1, 512 }
  0x92   : > { %p1083_p0 = scmp.ne.s32.totalorder %s1414_s19, %s1082_s16  ;;  %p1088_p6 = scmp.lt.u32.totalorder %s1414_s19, %s1577_s1 }
  0x93   : > { %p1089_p10 = scmp.lt.u32.totalorder %s1087_s3, %s1082_s16  ;;  %p1091_p7 = scmp.lt.u32.totalorder %s1082_s16, %s1414_s19 }
  0x94   : > { %p1085_p8 = pnand %p1083_p0, %p1054_p9 }
  0x95   : > { %p1090_p3 = por %p1089_p10, %p1088_p6 }
  0x96   : > { %p1086_p13 = pneg %p1085_p8 }
  0x97   : > { %p1092_p12 = por %p1091_p7, %p1090_p3 }
  0x99   : > { %p1093_p1 = pnand %p1092_p12, %p1086_p13 }
  0x9b   : > { %1096 = shalt.err (!%p1093_p1)
}
  0x9c   : > { %s1097_s12 = scalar_lea.vmem %s1449_s8, 256  ;;  %s1198_s26 = smov [#allocation5]  }
  0x9d   : > { %p1098_p2 = scmp.ne.s32.totalorder %s1449_s8, %s1097_s12  ;;  %s1102_s10 = sshll.u32 %s1198_s26, 4  ;;  %s1103_s10 = int_to_ptr.vmem [resolvable:$false] %s1102_s10 }
  0x9e   : > { %s1104_s0 = scalar_lea.vmem %s1103_s10, 512  ;;  %p1105_p8 = scmp.lt.s32.totalorder %s1449_s8, %s1103_s10 }
  0x9f   : > { %p1100_p4 = pnand %p1098_p2, %p1054_p9  ;;  %p1106_p6 = scmp.lt.s32.totalorder %s1104_s0, %s1097_s12 }
  0xa1   : > { %p1101_p0 = pneg %p1100_p4  ;;  %p1107_p10 = por %p1106_p6, %p1105_p8 }
  0xa3   : > { %p1108_p3 = pnand %p1107_p10, %p1101_p0 }
  0xa5   : > { %1111 = shalt.err (!%p1108_p3)
}
  0xa6   : > { %916 = dma.hbm_to_vmem [thread:$0]  (!%p1405_p11), %s1414_s19, 256, %s1449_s8, %s1451_s7, %s1608_s4, %s1608_s4, %s1607_s2  }
  0xa7   : > { %p1609_p9 = scmp.ne.s32.totalorder %s1596_s29, 0 }
  0xa8   : > { %s1483_s14 = sand.u32 (!%p1609_p9), 1, %s1182_s22   ;;  %p1610_p13 = scmp.ne.s32.totalorder (!%p1609_p9), %s1594_s27, 0 }
  0xa9   : > { %292 = sbr.rel (%p1609_p9) target bundleno = 438 (0x1b6), region = 44  ;;  %s1486_s20 = sshll.u32 (!%p1609_p9), %s1483_s14, 4 }
  0xaa   : > { %s295_s11 = scalar_lea.sflag (!%p1609_p9), [#allocation3], %s1483_s14  ;;  %s298_s30 = scalar_lea.vmem (!%p1609_p9), [#allocation2], %s1486_s20 }
  0xb0   : > { %1157 = dma.done.wait (%p1610_p13), %s295_s11, 256  }
  0xb1   : > { %1159 = vsyncadd (%p1610_p13), %s295_s11, 4294967040  ;;  %s303_s29 = sand.u32 1, %s1258_s25   ;;  %s307_s2 = scalar_lea.vmem [#allocation5], %s1486_s20 }
  0xb2   : > { %s304_s19 = scalar_lea.sflag [#allocation6], %s303_s29 }
  0xb3   : > { %1161 = dma.done.wait (%p1610_p13), %s304_s19, 256  }
  0xb4   : > { %1163 = vsyncadd (%p1610_p13), %s304_s19, 4294967040  ;;  %p1611_p11 = scmp.eq.s32.totalorder %s1258_s25, 0 }
  0xb6   : > { %1165 = dma.done.wait (%p1611_p11), [#allocation6], 512   ;;  %p1612_p7 = pmov %p1611_p11 }
  0xb8   : > { %1167 = vsyncadd (%p1612_p7), [#allocation6], 4294966784  ;;  %p1613_p12 = pmov %p1612_p7 }
  0xb9   : > { %p1614_p1 = pmov %p1612_p7 }
  0xba   : > { %1169 = dma.done.wait (%p1613_p12), [#allocation9], 1024  }
  0xbb   : > { %1171 = vsyncadd (%p1614_p1), [#allocation9], 4294966272  ;;  %vm370_vm0 = vcmask 261120   ;;  %v362_v0 = vld [vmem:[#allocation7] sm:$0xff]  ;;  %v363_v1 = vld [vmem:[#allocation7 + $0x8] sm:$0xff]  ;;  %s352_s27 = scalar_lea.vmem [#allocation11], %s1486_s20 }
  0xbc   : > { %v364_v2 = vld [vmem:[#allocation7 + $0x10] sm:$0xff]  ;;  %v862_v3 = vpack.c.bf16 %v363_v1, %v362_v0  ;;  %v365_v4 = vld [vmem:[#allocation7 + $0x18] sm:$0xff]  ;;  %v366_v6 = vld [vmem:[#allocation8] sm:$0xff]  ;;  %s645_s4 = sshll.u32 %s352_s27, 4  ;;  %s802_s7 = sshll.u32 %s1258_s25, 8  ;;  %s1527_s4 = int_to_ptr.vmem [resolvable:$true] %s645_s4 }
  0xbd   : > { %v356_v5 = vld [vmem:[%s298_s30] sm:$0xff]  ;;  %v866_v7 = vpack.c.bf16 %v365_v4, %v364_v2  ;;  %v367_v8 = vld [vmem:[#allocation8 + $0x8] sm:$0xff]  ;;  %v369_v13 = vld [vmem:[#allocation8 + $0x18] sm:$0xff]  ;;  %s1532_s17 = scalar_lea.hbm %s1582_s6, %s802_s7  ;;  %s632_s3 = scalar_lea.sflag [#allocation4], %s1483_s14 }
  0xbe   : > { %840 = vmatprep.mubr.msk.f32.mxu0 %vm370_vm0, %v356_v5  ;;  %v533_v9 = vld [vmem:[#allocation10] sm:$0xff]  ;;  %863 = vmatprep.subr.bf16.mxu0 %v862_v3  ;;  %v854_v10 = vpack.c.bf16 %v367_v8, %v366_v6  ;;  %v534_v11 = vld [vmem:[#allocation10 + $0x8] sm:$0xff]  ;;  %v368_v12 = vld [vmem:[#allocation8 + $0x10] sm:$0xff]  ;;  %s1112_s12 = scalar_lea.vmem %s1527_s4, 256  ;;  %s1199_s25 = smov [#allocation11]  }
  0xbf   : > { %865 = vmatpush3.bf16.msra.mxu0 %v862_v3  ;;  %v858_v14 = vpack.c.bf16 %v369_v13, %v368_v12  ;;  %v358_v15 = vld [vmem:[%s307_s2] sm:$0xff]  ;;  %v870_v16 = vpack.c.bf16 %v534_v11, %v533_v9  ;;  %v536_v18 = vld [vmem:[#allocation10 + $0x18] sm:$0xff]  ;;  %p1113_p2 = scmp.ne.s32.totalorder %s1527_s4, %s1112_s12  ;;  %s1116_s26 = sshll.u32 %s1199_s25, 4  ;;  %s1117_s26 = int_to_ptr.vmem [resolvable:$false] %s1116_s26 }
  0xc0   : > { %867 = vmatprep.subr.bf16.mxu0 %v866_v7  ;;  %855 = vmatprep.subr.bf16.mxu1 %v854_v10  ;;  %v535_v17 = vld [vmem:[#allocation10 + $0x10] sm:$0xff]  ;;  %v357_v19 = vld [vmem:[%s298_s30 + $0x8] sm:$0xff]  ;;  %v360_v20 = vmul.f32 %v358_v15, %v356_v5  ;;  %v794_v27 = vld [vmem:[%s1581_s5] ss:$0 sm:$0xff]  ;;  %s1118_s10 = scalar_lea.vmem %s1117_s26, 512  ;;  %p1119_p8 = scmp.lt.s32.totalorder %s1527_s4, %s1117_s26 }
  0xc1   : > { %857 = vmatpush3.bf16.msra.mxu1 %v854_v10  ;;  %829 = vmatprep.mubr.msk.f32.mxu1 %vm370_vm0, %v358_v15  ;;  %v874_v21 = vpack.c.bf16 %v536_v18, %v535_v17  ;;  %v359_v22 = vld [vmem:[%s307_s2 + $0x8] sm:$0xff]  ;;  %p1114_p4 = pnand %p1113_p2, %p1391_p5  ;;  %p1120_p6 = scmp.lt.s32.totalorder %s1118_s10, %s1112_s12 }
  0xc2   : > { %859 = vmatprep.subr.bf16.mxu1 %v858_v14  ;;  %v361_v23 = vmul.f32 %v359_v22, %v357_v19 }
  0xc3   : > { %869 = vmatpush3.bf16.msra.mxu0 %v866_v7  ;;  %p1115_p0 = pneg %p1114_p4  ;;  %p1121_p10 = por %p1120_p6, %p1119_p8 }
  0xc4   : > { %871 = vmatprep.subr.bf16.mxu0 %v870_v16 }
  0xc5   : > { %861 = vmatpush3.bf16.msra.mxu1 %v858_v14  ;;  %p1122_p3 = pnand %p1121_p10, %p1115_p0 }
  0xc6   : > { %841 = vmatmul.mubr.msk.f32.vlgmr.msra.gmra.mrb[0].mxu0 %vm370_vm0, %v357_v19 }
  0xc7   : > { %873 = vmatpush3.bf16.msra.mxu0 %v870_v16  ;;  %851 = vmatprep.mubr.msk.f32.mxu0 %vm370_vm0, %v360_v20 }
  0xc8   : > { %875 = vmatprep.subr.bf16.mxu0 %v874_v21  ;;  %830 = vmatmul.mubr.msk.f32.vlgmr.msra.gmra.mrb[0].mxu1 %vm370_vm0, %v359_v22 }
  0xcb   : > { %877 = vmatpush3.bf16.msra.mxu0 %v874_v21 }
  0xce   : > { %852 = vmatmul.mubr.msk.f32.vlgmr.msra.gmra.mrb[0].mxu0 %vm370_vm0, %v361_v23 }
 0x19b   : > { %v831_v24 = vpop.f32.mrb[0].mxu1 }
 0x19c   : > { %v443_v25 = vpop.f32.mrb[1].mxu1 }
 0x1a1   : > { %v853_v26 = vpop.f32.mrb[0].mxu0 }
 0x1a2   : > { %v878_v28 = vadd.f32 %v853_v26, %v831_v24  ;;  %v609_v29 = vpop.f32.mrb[1].mxu0 }
 0x1a3   : > { %v879_v30 = vadd.f32 %v609_v29, %v443_v25 }
 0x1a4   : > { %v628_v31 = vadd.f32 %v878_v28, %v794_v27 }
 0x1a5   : > { %v627_v32 = vadd.f32 %v879_v30, %v794_v27 }
 0x1a6   : > { %630 = vst [vmem:[%s352_s27 + $0x8] sm:$0xff] %v628_v31 }
 0x1a7   : > { %629 = vst [vmem:[%s352_s27] sm:$0xff] %v627_v32 }
 0x1a8   : > { %1125 = shalt.err (!%p1122_p3)
}
 0x1a9   : > { %s1126_s0 = scalar_lea.hbm %s1532_s17, 256  ;;  %s1130_s30 = scalar_lea.hbm %s1582_s6, 512 }
 0x1aa   : > { %p1127_p9 = scmp.ne.s32.totalorder %s1532_s17, %s1126_s0  ;;  %p1131_p7 = scmp.lt.u32.totalorder %s1532_s17, %s1582_s6 }
 0x1ab   : > { %p1132_p12 = scmp.lt.u32.totalorder %s1130_s30, %s1126_s0  ;;  %p1134_p2 = scmp.lt.u32.totalorder %s1126_s0, %s1532_s17 }
 0x1ac   : > { %p1128_p13 = pnand %p1127_p9, %p1391_p5 }
 0x1ad   : > { %p1133_p1 = por %p1132_p12, %p1131_p7 }
 0x1ae   : > { %p1129_p11 = pneg %p1128_p13 }
 0x1af   : > { %p1135_p4 = por %p1134_p2, %p1133_p1 }
 0x1b1   : > { %p1136_p0 = pnand %p1135_p4, %p1129_p11 }
 0x1b3   : > { %1139 = shalt.err (!%p1136_p0)
}
 0x1b4   : > { %s1200_s2 = smov 128   ;;  %s1201_s27 = smov 8  }
 0x1b5   : > { %898 = dma.vmem_to_hbm [thread:$0]  (%p1391_p5), %s1527_s4, 256, %s1532_s17, %s632_s3, %s1200_s2, %s1200_s2, %s1201_s27  }
 0x1b6 PF: > { %s660_s8 = sand.u32 1, %s1178_s21   ;;  %p1615_p8 = scmp.ne.s32.totalorder %s1595_s28, 0 }
 0x1b7   : > { %p1616_p6 = scmp.ge.s32.totalorder %s1190_s24, 2  ;;  %s661_s13 = scalar_lea.sflag [#allocation4], %s660_s8 }
 0x1b9   : > { %p918_p10 = pnand %p1616_p6, %p1615_p8 }
 0x1bb   : > { %1173 = dma.done.wait (!%p918_p10), %s661_s13, 256  }
 0x1bc   : > { %1175 = vsyncadd (!%p918_p10), %s661_s13, 4294967040  ;;  %s1617_s7 = sld [smem:[#allocation17_spill]]  ;;  %p23_p3 = scmp.ge.s32.totalorder %s1377_s18, 4  }
 0x1bd   : > { %s1618_s21 = smov %s1182_s22  ;;  %s1619_s22 = smov %s1186_s23 }
 0x1be   : > { %s1621_s24 = smov %s1377_s18  ;;  %25 = sbr.rel (!%p23_p3) target bundleno = 13 (0xd), region = 114 }
 0x1c2   : > { %s1620_s23 = smov %s1617_s7 }
 0x1c5   :  { %666 = vsyncpa [#allocation3], 1 }
 0x1c6   :  { %668 = vsyncpa [#allocation3 + $0x1], 1 }
 0x1c7   :  { %669 = vsyncpa [#allocation6], 1 }
 0x1c8   :  { %671 = vsyncpa [#allocation6 + $0x1], 1 }
 0x1c9   :  { %672 = vsyncpa [#allocation9], 1 }
 0x1ca   :  { %673 = vsyncpa [#allocation4], 1 }
 0x1cb   :  { %675 = vsyncpa [#allocation4 + $0x1], 1 }

</bundles_post_ra>
